<compile_context>
chip_gen: v7x
topology: tpu7x:2x2x1
jax: 0.10.0
libtpu: 0.0.40
codegen_flags: <defaults>
</compile_context>

<pallas_src>
import jax
import jax.numpy as jnp
from jax.experimental import pallas as pl
from jax.experimental.pallas import tpu as pltpu

# ----- hyper-params mirroring the argparse options of gan_pt/gan.py -----
LATENT_DIM = 32      # opt.latent_dim
CHANNELS   = 4       # opt.channels
IMG_SIZE   = 16      # opt.img_size
HIDDEN     = 128     # fixed in block(opt.latent_dim, 128)
LRELU_A    = 0.2     # opt.lrelu_a (standard GAN default)
IMG_FLAT   = CHANNELS * IMG_SIZE * IMG_SIZE   # int(np.prod(img_shape)) = 1024


def _round_up(x, m):
    return ((x + m - 1) // m) * m


def _choose_tb(B, block_b):
    """Batch tile: big enough to amortize per-step overhead, small enough to fit
    VMEM, and (when possible) giving >=2 grid steps so v7x's two TensorCores
    both get work via the 'parallel' dimension semantics."""
    block_b = max(16, _round_up(block_b, 16))
    if B > 2 * block_b:
        return block_b
    half = _round_up((B + 1) // 2, 16)      # split batch roughly in two
    if half >= B:
        return B                            # tiny batch: one full-array block
    return min(half, block_b)


def generator_kernel(z_ref, w1_ref, b1_ref, w2_ref, b2_ref, out_ref):
    # Layer 1: Linear(latent_dim -> 128) + LeakyReLU
    #   bf16 MXU operands, f32 accumulation; bias + activation in f32.
    z16 = z_ref[...].astype(jnp.bfloat16)
    h = jnp.dot(z16, w1_ref[...], preferred_element_type=jnp.float32) + b1_ref[...]
    h = jnp.where(h >= 0.0, h, LRELU_A * h)               # LeakyReLU(lrelu_a)
    # Layer 2: Linear(128 -> C*H*W) + Tanh
    o = jnp.dot(h.astype(jnp.bfloat16), w2_ref[...],
                preferred_element_type=jnp.float32) + b2_ref[...]
    # tanh in f32 (valid on every chip's EUP); store in the (bf16 by default)
    # output dtype -- the store is the binding resource of this kernel.
    out_ref[...] = jnp.tanh(o).astype(out_ref.dtype)


def generator_forward(z, w1, b1, w2, b2, *, block_b=1024, out_dtype=jnp.bfloat16):
    """z: (B, latent_dim) f32 -> img: (B, C, H, W) in `out_dtype` (NCHW layout).

    out_dtype=jnp.float32 gives strict PyTorch-dtype parity; the bf16 default
    halves the HBM writeback that dominates this kernel."""
    B = z.shape[0]
    tb = _choose_tb(B, block_b)
    grid = (pl.cdiv(B, tb),)                # partial last block handled by Pallas

    # Weights are expected to already be bf16 (see init_params); only insert a
    # cast if the caller handed us f32 weights.
    w1 = w1 if w1.dtype == jnp.bfloat16 else w1.astype(jnp.bfloat16)
    w2 = w2 if w2.dtype == jnp.bfloat16 else w2.astype(jnp.bfloat16)

    cparams = dict(dimension_semantics=("parallel",))     # megacore sharding
    if tb > 1024:
        # Bigger tiles need more scoped VMEM than the per-chip defaults
        # (v5e: 16 MiB, v6e/v7x: 32 MiB); tb<=1024 fits the defaults.
        cparams["vmem_limit_bytes"] = 64 * 1024 * 1024

    flat = pl.pallas_call(
        generator_kernel,
        out_shape=jax.ShapeDtypeStruct((B, IMG_FLAT), out_dtype),
        grid=grid,
        in_specs=[
            pl.BlockSpec((tb, LATENT_DIM),      lambda i: (i, 0)),  # z: tiled on B
            pl.BlockSpec((LATENT_DIM, HIDDEN),  lambda i: (0, 0)),  # w1: resident
            pl.BlockSpec((1, HIDDEN),           lambda i: (0, 0)),  # b1: resident
            pl.BlockSpec((HIDDEN, IMG_FLAT),    lambda i: (0, 0)),  # w2: resident
            pl.BlockSpec((1, IMG_FLAT),         lambda i: (0, 0)),  # b2: resident
        ],
        out_specs=pl.BlockSpec((tb, IMG_FLAT),  lambda i: (i, 0)),  # lane-dense 1024
        compiler_params=pltpu.CompilerParams(**cparams),
    )(z, w1, b1, w2, b2)

    # PyTorch: img.view(B, channels, img_size, img_size)
    return flat.reshape(B, CHANNELS, IMG_SIZE, IMG_SIZE)


def init_params(key):
    """Deterministic init mimicking nn.Linear default (uniform +-1/sqrt(fan_in)).
    Weights are stored in bf16 once here (MXU operand dtype) so the per-call
    wrapper never re-converts them; biases stay f32."""
    k1, k2, k3, k4 = jax.random.split(key, 4)
    lim1 = 1.0 / jnp.sqrt(LATENT_DIM)
    lim2 = 1.0 / jnp.sqrt(HIDDEN)
    w1 = jax.random.uniform(k1, (LATENT_DIM, HIDDEN), jnp.float32, -lim1, lim1)
    b1 = jax.random.uniform(k2, (1, HIDDEN),          jnp.float32, -lim1, lim1)
    w2 = jax.random.uniform(k3, (HIDDEN, IMG_FLAT),   jnp.float32, -lim2, lim2)
    b2 = jax.random.uniform(k4, (1, IMG_FLAT),        jnp.float32, -lim2, lim2)
    return w1.astype(jnp.bfloat16), b1, w2.astype(jnp.bfloat16), b2


if __name__ == "__main__":
    key = jax.random.PRNGKey(0)
    kz, kp = jax.random.split(key)

    B = 2
    z = jax.random.normal(kz, (B, LATENT_DIM), jnp.float32)
    w1, b1, w2, b2 = init_params(kp)

    img = generator_forward(z, w1, b1, w2, b2)
    img = jax.block_until_ready(img)

    # Sanity check vs. pure-JAX reference using the same bf16-operand / f32-accum
    # math and a matching bf16 output cast.
    f32 = jnp.float32
    z16 = z.astype(jnp.bfloat16).astype(f32)
    w1e = w1.astype(f32)
    w2e = w2.astype(f32)
    h_ref = z16 @ w1e + b1
    h_ref = jnp.where(h_ref >= 0.0, h_ref, LRELU_A * h_ref)
    h16 = h_ref.astype(jnp.bfloat16).astype(f32)
    ref = jnp.tanh(h16 @ w2e + b2).astype(jnp.bfloat16).astype(f32)
    ref = ref.reshape(B, CHANNELS, IMG_SIZE, IMG_SIZE)

    assert img.shape == (B, CHANNELS, IMG_SIZE, IMG_SIZE)
    assert img.dtype == jnp.bfloat16
    assert jnp.allclose(img.astype(f32), ref, atol=2e-2, rtol=2e-2)

    print("KERNEL_OK")
</pallas_src>

<mosaic_0001>
module attributes {stable_mosaic.version = 11 : i64} {
  func.func @generator_kernel(%arg0: i32, %arg1: memref<2x32xf32, #tpu.memory_space<vmem>>, %arg2: memref<32x128xbf16, #tpu.memory_space<vmem>>, %arg3: memref<1x128xf32, #tpu.memory_space<vmem>>, %arg4: memref<128x1024xbf16, #tpu.memory_space<vmem>>, %arg5: memref<1x1024xf32, #tpu.memory_space<vmem>>, %arg6: memref<2x1024xbf16, #tpu.memory_space<vmem>>) attributes {dimension_semantics = [#tpu.dimension_semantics<parallel>], iteration_bounds = array<i64: 1>, scalar_prefetch = 0 : i64, scratch_operands = 0 : i64, tpu.core_type = #tpu.core_type<tc>, window_params = [{transform_indices = @transform_0, window_bounds = array<i64: 2, 32>}, {pipeline_mode = #tpu.pipeline_mode<synchronous>, transform_indices = @transform_1, window_bounds = array<i64: 32, 128>}, {pipeline_mode = #tpu.pipeline_mode<synchronous>, transform_indices = @transform_2, window_bounds = array<i64: 1, 128>}, {pipeline_mode = #tpu.pipeline_mode<synchronous>, transform_indices = @transform_3, window_bounds = array<i64: 128, 1024>}, {pipeline_mode = #tpu.pipeline_mode<synchronous>, transform_indices = @transform_4, window_bounds = array<i64: 1, 1024>}, {transform_indices = @transform_5, window_bounds = array<i64: 2, 1024>}]} {
    %c0 = arith.constant 0 : index
    %c0_0 = arith.constant 0 : index
    %0 = vector.load %arg1[%c0, %c0_0] : memref<2x32xf32, #tpu.memory_space<vmem>>, vector<2x32xf32>
    %1 = arith.truncf %0 : vector<2x32xf32> to vector<2x32xbf16>
    %c0_1 = arith.constant 0 : index
    %c0_2 = arith.constant 0 : index
    %2 = vector.load %arg2[%c0_1, %c0_2] : memref<32x128xbf16, #tpu.memory_space<vmem>>, vector<32x128xbf16>
    %cst = arith.constant dense<0.000000e+00> : vector<2x128xf32>
    %3 = tpu.matmul %1, %2, %cst {dimension_numbers = #tpu.dot_dimension_numbers<[1], [0], [0], [1], [0, 0, 1, 1], [], []>} : vector<2x32xbf16>, vector<32x128xbf16>, vector<2x128xf32> -> vector<2x128xf32>
    %c0_3 = arith.constant 0 : index
    %c0_4 = arith.constant 0 : index
    %4 = vector.load %arg3[%c0_3, %c0_4] : memref<1x128xf32, #tpu.memory_space<vmem>>, vector<1x128xf32>
    %5 = vector.broadcast %4 : vector<1x128xf32> to vector<2x128xf32>
    %6 = arith.addf %3, %5 : vector<2x128xf32>
    %cst_5 = arith.constant 0.000000e+00 : f32
    %7 = vector.broadcast %cst_5 : f32 to vector<2x128xf32>
    %8 = arith.cmpf oge, %6, %7 : vector<2x128xf32>
    %cst_6 = arith.constant 2.000000e-01 : f32
    %9 = vector.broadcast %cst_6 : f32 to vector<2x128xf32>
    %10 = arith.mulf %9, %6 : vector<2x128xf32>
    %11 = arith.select %8, %6, %10 : vector<2x128xi1>, vector<2x128xf32>
    %12 = arith.truncf %11 : vector<2x128xf32> to vector<2x128xbf16>
    %c0_7 = arith.constant 0 : index
    %c0_8 = arith.constant 0 : index
    %13 = vector.load %arg4[%c0_7, %c0_8] : memref<128x1024xbf16, #tpu.memory_space<vmem>>, vector<128x1024xbf16>
    %cst_9 = arith.constant dense<0.000000e+00> : vector<2x1024xf32>
    %14 = tpu.matmul %12, %13, %cst_9 {dimension_numbers = #tpu.dot_dimension_numbers<[1], [0], [0], [1], [0, 0, 1, 1], [], []>} : vector<2x128xbf16>, vector<128x1024xbf16>, vector<2x1024xf32> -> vector<2x1024xf32>
    %c0_10 = arith.constant 0 : index
    %c0_11 = arith.constant 0 : index
    %15 = vector.load %arg5[%c0_10, %c0_11] : memref<1x1024xf32, #tpu.memory_space<vmem>>, vector<1x1024xf32>
    %16 = vector.broadcast %15 : vector<1x1024xf32> to vector<2x1024xf32>
    %17 = arith.addf %14, %16 : vector<2x1024xf32>
    %18 = math.tanh %17 : vector<2x1024xf32>
    %19 = arith.truncf %18 : vector<2x1024xf32> to vector<2x1024xbf16>
    %c0_12 = arith.constant 0 : index
    %c0_13 = arith.constant 0 : index
    %20 = vector.load %arg6[%c0_12, %c0_13] : memref<2x1024xbf16, #tpu.memory_space<vmem>>, vector<2x1024xbf16>
    tpu.vector_store %arg6[%c0_12, %c0_13], %19 {strides = array<i32>} : memref<2x1024xbf16, #tpu.memory_space<vmem>>, vector<2x1024xbf16>,
    return
  }
  func.func @transform_0(%arg0: i32) -> (i32, i32) {
    %c0_i32 = arith.constant 0 : i32
    %c0_i32_0 = arith.constant 0 : i32
    return %arg0, %c0_i32 : i32, i32
  }
  func.func @transform_1(%arg0: i32) -> (i32, i32) {
    %c0_i32 = arith.constant 0 : i32
    %c0_i32_0 = arith.constant 0 : i32
    %c0_i32_1 = arith.constant 0 : i32
    return %c0_i32, %c0_i32_0 : i32, i32
  }
  func.func @transform_2(%arg0: i32) -> (i32, i32) {
    %c0_i32 = arith.constant 0 : i32
    %c0_i32_0 = arith.constant 0 : i32
    %c0_i32_1 = arith.constant 0 : i32
    return %c0_i32, %c0_i32_0 : i32, i32
  }
  func.func @transform_3(%arg0: i32) -> (i32, i32) {
    %c0_i32 = arith.constant 0 : i32
    %c0_i32_0 = arith.constant 0 : i32
    %c0_i32_1 = arith.constant 0 : i32
    return %c0_i32, %c0_i32_0 : i32, i32
  }
  func.func @transform_4(%arg0: i32) -> (i32, i32) {
    %c0_i32 = arith.constant 0 : i32
    %c0_i32_0 = arith.constant 0 : i32
    %c0_i32_1 = arith.constant 0 : i32
    return %c0_i32, %c0_i32_0 : i32, i32
  }
  func.func @transform_5(%arg0: i32) -> (i32, i32) {
    %c0_i32 = arith.constant 0 : i32
    %c0_i32_0 = arith.constant 0 : i32
    return %arg0, %c0_i32 : i32, i32
  }
}

</mosaic_0001>

<bundles_post_ra>
// kernel: tpu_custom_call.1
= control target key start
LH: loop header
LB: loop body
LE: loop exit
PB: predicated region body
PF: predicated region fallthrough
CT: control target
= control target key end

     0   :  { %10 = vsyncpa [#allocation3], 0  ;;  %s1124_s0 = inlined_call_operand.hbm [shape: f32[2,32], index: 0, kind: input, shape index: {}]   ;;  %s1125_s1 = inlined_call_operand.hbm [shape: bf16[32,128], index: 1, kind: input, shape index: {}]   ;;  %s1126_s2 = inlined_call_operand.vmem [shape: f32[1,128], index: 2, kind: input, shape index: {}]   ;;  %s1127_s3 = inlined_call_operand.hbm [shape: bf16[128,1024], index: 3, kind: input, shape index: {}]   ;;  %s1128_s4 = inlined_call_operand.vmem [shape: f32[1,1024], index: 4, kind: input, shape index: {}]   ;;  %s1129_s5 = inlined_call_operand.hbm [shape: bf16[2,1024], index: 5, kind: output, shape index: {}]  }
   0x1   :  { %11 = vsyncpa [#allocation6], 0 }
   0x2   :  { %12 = vsyncpa [#allocation4], 0  ;;  %s1022_s18 = smov [#allocation5]   ;;  %s928_s22 = scalar_lea.hbm %s1125_s1, 256 }
   0x3   :  { %s28_s19 = sshll.u32 %s1022_s18, 4  ;;  %p929_p0 = scmp.ne.s32.totalorder %s1125_s1, %s928_s22  ;;  %s29_s19 = int_to_ptr.vmem [resolvable:$true] %s28_s19 }
   0x4   :  { %p932_p1 = scmp.lt.u32.totalorder %s928_s22, %s1125_s1 }
   0x6   :  { %p934_p2 = pnand %p932_p1, %p929_p0 }
   0x8   :  { %937 = shalt.err (!%p934_p2)
}
   0x9   :  { %s938_s27 = scalar_lea.vmem %s29_s19, 256  ;;  %p943_p4 = scmp.lt.s32.totalorder %s29_s19, %s29_s19 }
   0xa   :  { %p939_p3 = scmp.ne.s32.totalorder %s29_s19, %s938_s27  ;;  %p944_p5 = scmp.lt.s32.totalorder %s938_s27, %s938_s27 }
   0xc   :  { %p945_p6 = por %p944_p5, %p943_p4 }
   0xe   :  { %p946_p7 = pnand %p945_p6, %p939_p3 }
  0x10   :  { %949 = shalt.err (!%p946_p7)
}
  0x11   :  { %s1023_s28 = smov 64   ;;  %s1024_s29 = smov 4  }
  0x12   :  { %34 = dma.hbm_to_vmem [thread:$0]  %s1125_s1, 256, %s29_s19, [#allocation6], %s1023_s28, %s1023_s28, %s1024_s29  }
  0x13   :  { %s1025_s7 = smov [#allocation2]   ;;  %s1026_s9 = smov [#allocation7]  }
  0x14   :  { %s19_s8 = sshll.u32 %s1025_s7, 4  ;;  %s42_s10 = sshll.u32 %s1026_s9, 4  ;;  %s20_s8 = int_to_ptr.vmem [resolvable:$true] %s19_s8  ;;  %s43_s10 = int_to_ptr.vmem [resolvable:$true] %s42_s10 }
  0x15   :  { %s950_s13 = scalar_lea.hbm %s1124_s0, 32 }
  0x16   :  { %p951_p8 = scmp.ne.s32.totalorder %s1124_s0, %s950_s13  ;;  %p954_p9 = scmp.lt.u32.totalorder %s950_s13, %s1124_s0 }
  0x18   :  { %p956_p10 = pnand %p954_p9, %p951_p8 }
  0x1a   :  { %959 = shalt.err (!%p956_p10)
}
  0x1b   :  { %s960_s1 = scalar_lea.vmem %s20_s8, 32  ;;  %p965_p12 = scmp.lt.s32.totalorder %s20_s8, %s20_s8 }
  0x1c   :  { %p961_p11 = scmp.ne.s32.totalorder %s20_s8, %s960_s1  ;;  %p966_p13 = scmp.lt.s32.totalorder %s960_s1, %s960_s1 }
  0x1e   :  { %p967_p0 = por %p966_p13, %p965_p12 }
  0x20   :  { %p968_p1 = pnand %p967_p0, %p961_p11 }
  0x22   :  { %971 = shalt.err (!%p968_p1)
}
  0x23   :  { %22 = dma.hbm_to_vmem [thread:$0]  %s1124_s0, 32, %s20_s8, [#allocation3]  }
  0x24   :  { %s972_s22 = scalar_lea.hbm %s1127_s3, 8192 }
  0x25   :  { %p973_p2 = scmp.ne.s32.totalorder %s1127_s3, %s972_s22  ;;  %p976_p3 = scmp.lt.u32.totalorder %s972_s22, %s1127_s3 }
  0x27   :  { %p978_p4 = pnand %p976_p3, %p973_p2 }
  0x29   :  { %981 = shalt.err (!%p978_p4)
}
  0x2a   :  { %s982_s27 = scalar_lea.vmem %s43_s10, 8192  ;;  %p987_p6 = scmp.lt.s32.totalorder %s43_s10, %s43_s10 }
  0x2b   :  { %p983_p5 = scmp.ne.s32.totalorder %s43_s10, %s982_s27  ;;  %p988_p7 = scmp.lt.s32.totalorder %s982_s27, %s982_s27 }
  0x2d   :  { %p989_p8 = por %p988_p7, %p987_p6 }
  0x2f   :  { %p990_p9 = pnand %p989_p8, %p983_p5 }
  0x31   :  { %993 = shalt.err (!%p990_p9)
}
  0x32   :  { %s1027_s0 = smov 512   ;;  %s1028_s28 = smov 32  }
  0x33   :  { %48 = dma.hbm_to_vmem [thread:$0]  %s1127_s3, 8192, %s43_s10, [#allocation6], %s1027_s0, %s1027_s0, %s1028_s28  }
  0x34   :  { %1016 = dma.done.wait [#allocation3], 32  }
  0x35   :  { %1017 = vsyncadd [#allocation3], 4294967264 }
  0x36   :  { %1018 = dma.done.wait [#allocation6], 8448  }
  0x37   :  { %1019 = vsyncadd [#allocation6], 4294958848  ;;  %v1029_v0 = vmov 0.0   ;;  %vm1030_vm0 = vmmov 0   ;;  %v910_v1 = vld [vmem:[#allocation5] sm:$0xff]   ;;  %v911_v2 = vld [vmem:[#allocation5 + $0x8] sm:$0xff]  }
  0x38   :  { %890 = vmatprep.subr.bf16.mxu0 %v1029_v0  ;;  %894 = vmatprep.mubr.msk.bf16.mxu0 %vm1030_vm0, %v1029_v0  ;;  %v61_v3 = vld [vmem:[#allocation2] sm:$0x3]  ;;  %v134_v4 = vld [vmem:[#allocation7] sm:$0xff]  ;;  %vm86_vm1 = vcmask 261120  }
  0x39   :  { %891 = vmatpush3.bf16.msra.mxu0 %v910_v1  ;;  %v138_v5 = vld [vmem:[#allocation7 + $0x20] sm:$0xff]  ;;  %v135_v7 = vld [vmem:[#allocation7 + $0x8] sm:$0xff]  ;;  %v62_v15 = vpack.c.bf16 %v61_v3, %v61_v3 }
  0x3a   :  { %892 = vmatprep.subr.bf16.mxu0 %v1029_v0  ;;  %v820_v6 = vcombine.high %v134_v4, %v138_v5  ;;  %v139_v8 = vld [vmem:[#allocation7 + $0x28] sm:$0xff]  ;;  %v819_v9 = vcombine.low %v134_v4, %v138_v5  ;;  %v142_v10 = vld [vmem:[#allocation7 + $0x40] sm:$0xff]  ;;  %v136_v5 = vld [vmem:[#allocation7 + $0x10] sm:$0xff] }
  0x3b   :  { %v822_v11 = vcombine.high %v135_v7, %v139_v8  ;;  %v146_v12 = vld [vmem:[#allocation7 + $0x60] sm:$0xff]  ;;  %v143_v13 = vld [vmem:[#allocation7 + $0x48] sm:$0xff]  ;;  %v821_v19 = vcombine.low %v135_v7, %v139_v8  ;;  %v137_v7 = vld [vmem:[#allocation7 + $0x18] sm:$0xff] }
  0x3c   :  { %v147_v14 = vld [vmem:[#allocation7 + $0x68] sm:$0xff]  ;;  %560 = vmatprep.subr.bf16.mxu1 %v820_v6  ;;  %v828_v16 = vcombine.high %v142_v10, %v146_v12  ;;  %v150_v17 = vld [vmem:[#allocation7 + $0x80] sm:$0xff]  ;;  %v827_v20 = vcombine.low %v142_v10, %v146_v12  ;;  %v140_v6 = vld [vmem:[#allocation7 + $0x30] sm:$0xff] }
  0x3d   :  { %v154_v18 = vld [vmem:[#allocation7 + $0xa0] sm:$0xff]  ;;  %893 = vmatpush3.bf16.msra.mxu0 %v911_v2  ;;  %561 = vmatpush1.bf16.msra.mxu1 %v819_v9  ;;  %v830_v21 = vcombine.high %v143_v13, %v147_v14  ;;  %v151_v23 = vld [vmem:[#allocation7 + $0x88] sm:$0xff]  ;;  %v829_v27 = vcombine.low %v143_v13, %v147_v14  ;;  %v824_v8 = vcombine.high %v136_v5, %v140_v6  ;;  %v141_v9 = vld [vmem:[#allocation7 + $0x38] sm:$0xff]  ;;  %v1031_v13 = vmov 0  }
  0x3e   :  { %601 = vmatprep.subr.bf16.mxu0 %v822_v11  ;;  %562 = vmatprep.subr.bf16.mxu1 %v828_v16  ;;  %v836_v22 = vcombine.high %v150_v17, %v154_v18  ;;  %v155_v24 = vld [vmem:[#allocation7 + $0xa8] sm:$0xff]  ;;  %v158_v25 = vld [vmem:[#allocation7 + $0xc0] sm:$0xff]  ;;  %v835_v28 = vcombine.low %v150_v17, %v154_v18  ;;  %v823_v10 = vcombine.low %v136_v5, %v140_v6  ;;  %v192_v5 = vld [vmem:[#allocation7 + $0x1d0] sm:$0xff] }
  0x3f   :  { %v162_v26 = vld [vmem:[#allocation7 + $0xe0] sm:$0xff]  ;;  %v838_v29 = vcombine.high %v151_v23, %v155_v24  ;;  %v159_v31 = vld [vmem:[#allocation7 + $0xc8] sm:$0xff]  ;;  %v837_v35 = vcombine.low %v151_v23, %v155_v24  ;;  %v825_v11 = vcombine.low %v137_v7, %v141_v9  ;;  %v826_v12 = vcombine.high %v137_v7, %v141_v9  ;;  %592 = vmatprep.mubr.bf16.mxu1 %v1031_v13  ;;  %v145_v23 = vld [vmem:[#allocation7 + $0x58] sm:$0xff] }
  0x40   :  { %895 = vmatmul.mubr.msk.bf16.vlgmr.msra.gmra.mrb[0].mxu0 %vm86_vm1, %v62_v15  ;;  %v844_v30 = vcombine.high %v158_v25, %v162_v26  ;;  %v163_v32 = vld [vmem:[#allocation7 + $0xe8] sm:$0xff]  ;;  %v166_v33 = vld [vmem:[#allocation7 + $0x100] sm:$0xff]  ;;  %v843_v36 = vcombine.low %v158_v25, %v162_v26  ;;  %v149_v24 = vld [vmem:[#allocation7 + $0x78] sm:$0xff] }
  0x41   :  { %602 = vmatpush1.bf16.msra.mxu0 %v821_v19  ;;  %563 = vmatpush1.bf16.msra.mxu1 %v827_v20  ;;  %v170_v34 = vld [vmem:[#allocation7 + $0x120] sm:$0xff]  ;;  %v846_v37 = vcombine.high %v159_v31, %v163_v32  ;;  %v167_v39 = vld [vmem:[#allocation7 + $0x108] sm:$0xff]  ;;  %v845_v43 = vcombine.low %v159_v31, %v163_v32  ;;  %v144_v19 = vld [vmem:[#allocation7 + $0x50] sm:$0xff] }
  0x42   :  { %603 = vmatprep.subr.bf16.mxu0 %v830_v21  ;;  %564 = vmatprep.subr.bf16.mxu1 %v836_v22  ;;  %v852_v38 = vcombine.high %v166_v33, %v170_v34  ;;  %v171_v40 = vld [vmem:[#allocation7 + $0x128] sm:$0xff]  ;;  %v174_v41 = vld [vmem:[#allocation7 + $0x140] sm:$0xff]  ;;  %v851_v44 = vcombine.low %v166_v33, %v170_v34  ;;  %v148_v20 = vld [vmem:[#allocation7 + $0x70] sm:$0xff]  ;;  %v833_v34 = vcombine.low %v145_v23, %v149_v24 }
  0x43   :  { %v178_v42 = vld [vmem:[#allocation7 + $0x160] sm:$0xff]  ;;  %v854_v45 = vcombine.high %v167_v39, %v171_v40  ;;  %v175_v47 = vld [vmem:[#allocation7 + $0x148] sm:$0xff]  ;;  %v853_v51 = vcombine.low %v167_v39, %v171_v40  ;;  %633 = vmatprep.mubr.bf16.mxu0 %v1031_v13  ;;  %v153_v31 = vld [vmem:[#allocation7 + $0x98] sm:$0xff]  ;;  %v831_v33 = vcombine.low %v144_v19, %v148_v20 }
  0x44   :  { %v860_v46 = vcombine.high %v174_v41, %v178_v42  ;;  %v179_v48 = vld [vmem:[#allocation7 + $0x168] sm:$0xff]  ;;  %v182_v49 = vld [vmem:[#allocation7 + $0x180] sm:$0xff]  ;;  %v859_v52 = vcombine.low %v174_v41, %v178_v42  ;;  %v157_v32 = vld [vmem:[#allocation7 + $0xb8] sm:$0xff] }
  0x45   :  { %604 = vmatpush1.bf16.msra.mxu0 %v829_v27  ;;  %565 = vmatpush1.bf16.msra.mxu1 %v835_v28  ;;  %v186_v50 = vld [vmem:[#allocation7 + $0x1a0] sm:$0xff]  ;;  %v862_v53 = vcombine.high %v175_v47, %v179_v48  ;;  %v183_v55 = vld [vmem:[#allocation7 + $0x188] sm:$0xff]  ;;  %v861_v57 = vcombine.low %v175_v47, %v179_v48  ;;  %v832_v27 = vcombine.high %v144_v19, %v148_v20  ;;  %v161_v39 = vld [vmem:[#allocation7 + $0xd8] sm:$0xff] }
  0x46   :  { %605 = vmatprep.subr.bf16.mxu0 %v838_v29  ;;  %566 = vmatprep.subr.bf16.mxu1 %v844_v30  ;;  %v868_v54 = vcombine.high %v182_v49, %v186_v50  ;;  %v187_v56 = vld [vmem:[#allocation7 + $0x1a8] sm:$0xff]  ;;  %v867_v60 = vcombine.low %v182_v49, %v186_v50  ;;  %v190_v61 = vld [vmem:[#allocation7 + $0x1c0] sm:$0xff]  ;;  %v834_v28 = vcombine.high %v145_v23, %v149_v24  ;;  %v152_v29 = vld [vmem:[#allocation7 + $0x90] sm:$0xff] }
  0x47   :  { %v870_v58 = vcombine.high %v183_v55, %v187_v56  ;;  %v869_v59 = vcombine.low %v183_v55, %v187_v56  ;;  %v194_v62 = vld [vmem:[#allocation7 + $0x1e0] sm:$0xff]  ;;  %v191_v63 = vld [vmem:[#allocation7 + $0x1c8] sm:$0xff]  ;;  %v156_v30 = vld [vmem:[#allocation7 + $0xb0] sm:$0xff]  ;;  %v841_v42 = vcombine.low %v153_v31, %v157_v32 }
  0x48   :  { %v876_v0 = vcombine.high %v190_v61, %v194_v62  ;;  %v195_v1 = vld [vmem:[#allocation7 + $0x1e8] sm:$0xff]  ;;  %v875_v4 = vcombine.low %v190_v61, %v194_v62  ;;  %v815_v14 = vld [vmem:[%s1126_s2] ss:$0 sm:$0xff]  ;;  %v165_v40 = vld [vmem:[#allocation7 + $0xf8] sm:$0xff]  ;;  %v839_v41 = vcombine.low %v152_v29, %v156_v30 }
  0x49   :  { %606 = vmatpush1.bf16.msra.mxu0 %v837_v35  ;;  %567 = vmatpush1.bf16.msra.mxu1 %v843_v36  ;;  %v877_v2 = vcombine.low %v191_v63, %v195_v1  ;;  %v878_v3 = vcombine.high %v191_v63, %v195_v1  ;;  %v840_v35 = vcombine.high %v152_v29, %v156_v30  ;;  %v169_v47 = vld [vmem:[#allocation7 + $0x118] sm:$0xff]  ;;  %v184_v61 = vld [vmem:[#allocation7 + $0x190] sm:$0xff]  ;;  %v198_v19 = vld [vmem:[%s1128_s4] sm:$0xff]  ;;  %s1033_s4 = smov [#allocation8]  }
  0x4a   :  { %607 = vmatprep.subr.bf16.mxu0 %v846_v37  ;;  %568 = vmatprep.subr.bf16.mxu1 %v852_v38  ;;  %v842_v36 = vcombine.high %v153_v31, %v157_v32  ;;  %v160_v37 = vld [vmem:[#allocation7 + $0xd0] sm:$0xff]  ;;  %v173_v48 = vld [vmem:[#allocation7 + $0x138] sm:$0xff]  ;;  %v849_v50 = vcombine.low %v161_v39, %v165_v40  ;;  %s805_s8 = sshll.u32 %s1033_s4, 4  ;;  %s806_s8 = int_to_ptr.vmem [resolvable:$true] %s805_s8 }
  0x4b   :  { %v164_v38 = vld [vmem:[#allocation7 + $0xf0] sm:$0xff]  ;;  %v177_v55 = vld [vmem:[#allocation7 + $0x158] sm:$0xff]  ;;  %s994_s9 = scalar_lea.vmem %s806_s8, 128  ;;  %p999_p11 = scmp.lt.s32.totalorder %s806_s8, %s806_s8 }
  0x4c   :  { %v847_v49 = vcombine.low %v160_v37, %v164_v38  ;;  %v181_v56 = vld [vmem:[#allocation7 + $0x178] sm:$0xff]  ;;  %v188_v62 = vld [vmem:[#allocation7 + $0x1b0] sm:$0xff]  ;;  %p995_p10 = scmp.ne.s32.totalorder %s806_s8, %s994_s9  ;;  %p1000_p12 = scmp.lt.s32.totalorder %s994_s9, %s994_s9 }
  0x4d   :  { %608 = vmatpush1.bf16.msra.mxu0 %v845_v43  ;;  %569 = vmatpush1.bf16.msra.mxu1 %v851_v44  ;;  %v848_v43 = vcombine.high %v160_v37, %v164_v38  ;;  %v850_v44 = vcombine.high %v161_v39, %v165_v40  ;;  %v185_v63 = vld [vmem:[#allocation7 + $0x198] sm:$0xff]  ;;  %v196_v6 = vld [vmem:[#allocation7 + $0x1f0] sm:$0xff]  ;;  %v871_v9 = vcombine.low %v184_v61, %v188_v62  ;;  %v1032_v38 = vmov 1966171168  }
  0x4e   :  { %609 = vmatprep.subr.bf16.mxu0 %v854_v45  ;;  %570 = vmatprep.subr.bf16.mxu1 %v860_v46  ;;  %v168_v45 = vld [vmem:[#allocation7 + $0x110] sm:$0xff]  ;;  %v193_v7 = vld [vmem:[#allocation7 + $0x1d8] sm:$0xff]  ;;  %v753_v39 = vunpack.c.l.s4 %v1032_v38  ;;  %p1001_p13 = por %p1000_p12, %p999_p11 }
  0x4f   :  { %v172_v46 = vld [vmem:[#allocation7 + $0x130] sm:$0xff] }
  0x50   :  { %v754_v40 = vunpack.c.0.s8 %v753_v39  ;;  %p1002_p0 = pnand %p1001_p13, %p995_p10 }
  0x51   :  { %610 = vmatpush1.bf16.msra.mxu0 %v853_v51  ;;  %571 = vmatpush1.bf16.msra.mxu1 %v859_v52  ;;  %v856_v51 = vcombine.high %v168_v45, %v172_v46  ;;  %v858_v52 = vcombine.high %v169_v47, %v173_v48 }
  0x52   :  { %611 = vmatprep.subr.bf16.mxu0 %v862_v53  ;;  %572 = vmatprep.subr.bf16.mxu1 %v868_v54  ;;  %v176_v53 = vld [vmem:[#allocation7 + $0x150] sm:$0xff] }
  0x53   :  { %v180_v54 = vld [vmem:[#allocation7 + $0x170] sm:$0xff] }
  0x54   :  { %v863_v1 = vcombine.low %v176_v53, %v180_v54 }
  0x55   :  { %612 = vmatpush1.bf16.msra.mxu0 %v861_v57  ;;  %573 = vmatpush1.bf16.msra.mxu1 %v867_v60  ;;  %v855_v57 = vcombine.low %v168_v45, %v172_v46  ;;  %v866_v60 = vcombine.high %v177_v55, %v181_v56 }
  0x56   :  { %613 = vmatprep.subr.bf16.mxu0 %v870_v58  ;;  %574 = vmatprep.subr.bf16.mxu1 %v876_v0  ;;  %v857_v58 = vcombine.low %v169_v47, %v173_v48  ;;  %v189_v0 = vld [vmem:[#allocation7 + $0x1b8] sm:$0xff] }
  0x59   :  { %614 = vmatpush1.bf16.msra.mxu0 %v869_v59  ;;  %575 = vmatpush1.bf16.msra.mxu1 %v875_v4  ;;  %v864_v59 = vcombine.high %v176_v53, %v180_v54  ;;  %v874_v4 = vcombine.high %v185_v63, %v189_v0 }
  0x5a   :  { %615 = vmatprep.subr.bf16.mxu0 %v878_v3  ;;  %642 = vmatprep.subr.bf16.mxu1 %v824_v8  ;;  %v872_v3 = vcombine.high %v184_v61, %v188_v62  ;;  %v197_v8 = vld [vmem:[#allocation7 + $0x1f8] sm:$0xff] }
  0x5d   :  { %616 = vmatpush1.bf16.msra.mxu0 %v877_v2  ;;  %v865_v2 = vcombine.low %v177_v55, %v181_v56 }
  0x5e   :  { %683 = vmatprep.subr.bf16.mxu0 %v826_v12  ;;  %v882_v12 = vcombine.high %v193_v7, %v197_v8 }
 0x113   :  { %v124_v15 = vpop.f32.mrb[0].mxu0 }
 0x114   :  { %v125_v16 = vadd.f32 %v815_v14, %v124_v15  ;;  %v896_v17 = vpop.f32.mrb[1].mxu0  ;;  %v881_v14 = vcombine.low %v193_v7, %v197_v8  ;;  %v200_v15 = vlaneseq }
 0x115   :  { %v127_v18 = vpop.f32.mrb[2].mxu0 }
 0x116   :  { %vm130_vm2 = vcmp.ge.f32.partialorder %v125_v16, 0.0  ;;  %v131_v21 = vmul.f32 0.2, %v125_v16  ;;  %v897_v22 = vpop.f32.mrb[3].mxu0 }
 0x118   :  { %v132_v25 = vsel %vm130_vm2, %v125_v16, %v131_v21  ;;  %v201_v16 = vshrl.u32 %v200_v15, 7 }
 0x119   :  { %v1103_v26 = vpack.c.bf16 %v132_v25, %v132_v25 }
 0x11a   :  { %v202_v17 = vsub.s32 0, %v201_v16  ;;  %v210_v18 = vsub.s32 2, %v201_v16  ;;  %v206_v20 = vsub.s32 1, %v201_v16  ;;  %v214_v21 = vsub.s32 3, %v201_v16 }
 0x11b   :  { %593 = vmatmul.mubr.bf16.vlgmr.msra.gmra.mrb[0].mxu1 %v1103_v26  ;;  %634 = vmatmul.mubr.bf16.vlgmr.msra.gmra.mrb[4].mxu0 %v1103_v26  ;;  %v222_v53 = vsub.s32 5, %v201_v16  ;;  %v230_v54 = vsub.s32 7, %v201_v16 }
 0x11c   :  { %643 = vmatpush1.bf16.msra.mxu1 %v823_v10  ;;  %684 = vmatpush1.bf16.msra.mxu0 %v825_v11  ;;  %v873_v10 = vcombine.low %v185_v63, %v189_v0  ;;  %v880_v11 = vcombine.high %v192_v5, %v196_v6  ;;  %v203_v22 = vrot.slane %v198_v19, %v202_v17 }
 0x11d   :  { %644 = vmatprep.subr.bf16.mxu1 %v832_v27  ;;  %685 = vmatprep.subr.bf16.mxu0 %v834_v28  ;;  %v211_v23 = vrot.slane %v198_v19, %v210_v18  ;;  %v207_v24 = vrot.slane %v198_v19, %v206_v20  ;;  %v215_v25 = vrot.slane %v198_v19, %v214_v21 }
 0x11e   :  { %674 = vmatprep.mubr.bf16.mxu1 %v1031_v13  ;;  %715 = vmatprep.mubr.bf16.mxu0 %v1031_v13  ;;  %v879_v13 = vcombine.low %v192_v5, %v196_v6 }
 0x120   :  { %645 = vmatpush1.bf16.msra.mxu1 %v831_v33  ;;  %686 = vmatpush1.bf16.msra.mxu0 %v833_v34 }
 0x121   :  { %646 = vmatprep.subr.bf16.mxu1 %v840_v35  ;;  %687 = vmatprep.subr.bf16.mxu0 %v842_v36 }
 0x124   :  { %647 = vmatpush1.bf16.msra.mxu1 %v839_v41  ;;  %688 = vmatpush1.bf16.msra.mxu0 %v841_v42 }
 0x125   :  { %648 = vmatprep.subr.bf16.mxu1 %v848_v43  ;;  %689 = vmatprep.subr.bf16.mxu0 %v850_v44  ;;  %v757_v43 = vsub.s32 %v754_v40, %v201_v16 }
 0x128   :  { %649 = vmatpush1.bf16.msra.mxu1 %v847_v49  ;;  %690 = vmatpush1.bf16.msra.mxu0 %v849_v50 }
 0x129   :  { %650 = vmatprep.subr.bf16.mxu1 %v856_v51  ;;  %691 = vmatprep.subr.bf16.mxu0 %v858_v52  ;;  %v218_v51 = vsub.s32 4, %v201_v16  ;;  %v226_v52 = vsub.s32 6, %v201_v16 }
 0x12b   :  { %v219_v55 = vrot.slane %v198_v19, %v218_v51  ;;  %v227_v56 = vrot.slane %v198_v19, %v226_v52 }
 0x12c   :  { %651 = vmatpush1.bf16.msra.mxu1 %v855_v57  ;;  %692 = vmatpush1.bf16.msra.mxu0 %v857_v58  ;;  %v223_v57 = vrot.slane %v198_v19, %v222_v53  ;;  %v231_v58 = vrot.slane %v198_v19, %v230_v54 }
 0x12d   :  { %652 = vmatprep.subr.bf16.mxu1 %v864_v59  ;;  %693 = vmatprep.subr.bf16.mxu0 %v866_v60 }
 0x130   :  { %653 = vmatpush1.bf16.msra.mxu1 %v863_v1  ;;  %694 = vmatpush1.bf16.msra.mxu0 %v865_v2 }
 0x131   :  { %654 = vmatprep.subr.bf16.mxu1 %v872_v3  ;;  %695 = vmatprep.subr.bf16.mxu0 %v874_v4 }
 0x134   :  { %655 = vmatpush1.bf16.msra.mxu1 %v871_v9  ;;  %696 = vmatpush1.bf16.msra.mxu0 %v873_v10 }
 0x135   :  { %656 = vmatprep.subr.bf16.mxu1 %v880_v11  ;;  %697 = vmatprep.subr.bf16.mxu0 %v882_v12 }
 0x138   :  { %657 = vmatpush1.bf16.msra.mxu1 %v879_v13  ;;  %698 = vmatpush1.bf16.msra.mxu0 %v881_v14 }
 0x13b   :  { %675 = vmatmul.mubr.bf16.vlgmr.msra.gmra.mrb[4].mxu1 %v1103_v26  ;;  %716 = vmatmul.mubr.bf16.vlgmr.msra.gmra.mrb[8].mxu0 %v1103_v26 }
 0x1ee   :  { %v594_v27 = vpop.f32.mrb[0].mxu1  ;;  %v635_v28 = vpop.f32.mrb[4].mxu0 }
 0x1ef   :  { %v595_v29 = vadd.f32 %v594_v27, %v203_v22  ;;  %v636_v30 = vadd.f32 %v635_v28, %v211_v23  ;;  %v596_v31 = vpop.f32.mrb[1].mxu1  ;;  %v637_v26 = vpop.f32.mrb[5].mxu0 }
 0x1f0   :  { %v597_v32 = vadd.f32 %v596_v31, %v207_v24  ;;  %v638_v33 = vadd.f32 %v637_v26, %v215_v25  ;;  %v598_v34 = vpop.f32.mrb[2].mxu1  ;;  %v639_v35 = vpop.f32.mrb[6].mxu0 }
 0x1f1   :  { %912 = vtanh.f32 %v595_v29  ;;  %v599_v36 = vpop.f32.mrb[3].mxu1  ;;  %v640_v37 = vpop.f32.mrb[7].mxu0 }
 0x1f2   :  { %914 = vtanh.f32 %v636_v30 }
 0x1f3   :  { %916 = vtanh.f32 %v597_v32 }
 0x1f4   :  { %918 = vtanh.f32 %v638_v33 }
 0x1fb   :  { %v913_v41 = vpop.eup %912 }
 0x1fc   :  { %v915_v42 = vpop.eup %914 }
 0x1fd   :  { %v917_v44 = vpop.eup %916 }
 0x1fe   :  { %v919_v45 = vpop.eup %918  ;;  %v883_v46 = vpack.c.bf16 %v917_v44, %v913_v41 }
 0x1ff   :  { %v884_v47 = vpack.c.bf16 %v919_v45, %v915_v42 }
 0x200   :  { %v758_v48 = vrot.slane %v883_v46, %v757_v43 }
 0x201   :  { %v765_v49 = vrot.slane %v884_v47, %v757_v43 }
 0x203   :  { %v780_v50 = vcombine.low %v758_v48, %v765_v49 }
 0x205   :  { %v788_v16 = vrot.slane %v780_v50, %v757_v43 }
 0x20e   :  { %v676_v59 = vpop.f32.mrb[4].mxu1  ;;  %v717_v60 = vpop.f32.mrb[8].mxu0 }
 0x20f   :  { %v677_v61 = vadd.f32 %v676_v59, %v219_v55  ;;  %v718_v62 = vadd.f32 %v717_v60, %v227_v56  ;;  %v678_v63 = vpop.f32.mrb[5].mxu1  ;;  %v719_v0 = vpop.f32.mrb[9].mxu0 }
 0x210   :  { %v679_v1 = vadd.f32 %v678_v63, %v223_v57  ;;  %v720_v2 = vadd.f32 %v719_v0, %v231_v58  ;;  %v680_v3 = vpop.f32.mrb[6].mxu1  ;;  %v721_v4 = vpop.f32.mrb[10].mxu0 }
 0x211   :  { %920 = vtanh.f32 %v677_v61  ;;  %v681_v5 = vpop.f32.mrb[7].mxu1  ;;  %v722_v6 = vpop.f32.mrb[11].mxu0 }
 0x212   :  { %922 = vtanh.f32 %v718_v62 }
 0x213   :  { %924 = vtanh.f32 %v679_v1 }
 0x214   :  { %926 = vtanh.f32 %v720_v2 }
 0x21b   :  { %v921_v7 = vpop.eup %920 }
 0x21c   :  { %v923_v8 = vpop.eup %922 }
 0x21d   :  { %v925_v9 = vpop.eup %924 }
 0x21e   :  { %v927_v10 = vpop.eup %926  ;;  %v885_v11 = vpack.c.bf16 %v925_v9, %v921_v7 }
 0x21f   :  { %v886_v12 = vpack.c.bf16 %v927_v10, %v923_v8 }
 0x220   :  { %v772_v13 = vrot.slane %v885_v11, %v757_v43 }
 0x221   :  { %v779_v14 = vrot.slane %v886_v12, %v757_v43 }
 0x223   :  { %v781_v15 = vcombine.low %v772_v13, %v779_v14 }
 0x225   :  { %v795_v17 = vrot.slane %v781_v15, %v757_v43 }
 0x227   :  { %v796_v18 = vcombine.low %v788_v16, %v795_v17 }
 0x229   :  { %798 = vst [vmem:[#allocation8] sm:$0xff] %v796_v18 }
 0x22a   :  { %1005 = shalt.err (!%p1002_p0)
}
 0x22b   :  { %s1006_s12 = scalar_lea.hbm %s1129_s5, 128 }
 0x22c   :  { %p1007_p1 = scmp.ne.s32.totalorder %s1129_s5, %s1006_s12  ;;  %p1010_p2 = scmp.lt.u32.totalorder %s1006_s12, %s1129_s5 }
 0x22e   :  { %p1012_p3 = pnand %p1010_p2, %p1007_p1 }
 0x230   :  { %1015 = shalt.err (!%p1012_p3)
}
 0x231   :  { %808 = dma.vmem_to_hbm [thread:$0]  %s806_s8, 128, %s1129_s5, [#allocation4]  }
 0x232   :  { %1020 = dma.done.wait [#allocation4], 128  }
 0x233   :  { %1021 = vsyncadd [#allocation4], 4294967168 }
 0x234   :  { %812 = vsyncpa [#allocation3], 1 }
 0x235   :  { %813 = vsyncpa [#allocation6], 1 }
 0x236   :  { %814 = vsyncpa [#allocation4], 1 }

</bundles_post_ra>
